<compile_context>
chip_gen: v5e
topology: v5e:2x2
jax: 0.10.0
libtpu: 0.0.40
codegen_flags: <defaults>
</compile_context>

<pallas_src>
import jax
import jax.numpy as jnp
from jax.experimental import pallas as pl
from jax.experimental.pallas import tpu as pltpu


def _generator_kernel(z_ref, w1_ref, b1_ref, w2_ref, b2_ref, out_ref):
    # z : (tm, Z) f32     w1: (Z, H) bf16    b1: (1, H) f32
    # w2: (H, tn) bf16    b2: (1, tn) f32    out: (tm, tn) f32
    h = jnp.dot(z_ref[...].astype(jnp.bfloat16), w1_ref[...],
                preferred_element_type=jnp.float32)
    h = jnp.maximum(h + b1_ref[...], 0.0)          # bias + ReLU in f32 (VPU)
    o = jnp.dot(h.astype(jnp.bfloat16), w2_ref[...],
                preferred_element_type=jnp.float32)
    o = o + b2_ref[...]
    out_ref[...] = jnp.tanh(o)                     # tanh rides the EUP slot


def _run_generator_small(z, w1, b1, w2, b2):
    """Overhead-minimal path: grid=(), every operand whole in VMEM."""
    B = z.shape[0]
    D = w2.shape[1]
    vmem = pl.BlockSpec(memory_space=pltpu.VMEM)
    return pl.pallas_call(
        _generator_kernel,
        out_shape=jax.ShapeDtypeStruct((B, D), jnp.float32),
        in_specs=[vmem, vmem, vmem, vmem, vmem],
        out_specs=vmem,
    )(z, w1, b1, w2, b2)


def _run_generator_tiled(z, w1, b1, w2, b2, tm, tn):
    """Gridded path for large B / D: N-tiled w2, both axes parallel."""
    B, Z = z.shape
    H, D = w2.shape
    grid = (B // tm, D // tn)
    return pl.pallas_call(
        _generator_kernel,
        out_shape=jax.ShapeDtypeStruct((B, D), jnp.float32),
        grid_spec=pltpu.PrefetchScalarGridSpec(
            num_scalar_prefetch=0,
            grid=grid,
            in_specs=[
                pl.BlockSpec((tm, Z), lambda i, j: (i, 0)),   # z rows
                pl.BlockSpec((Z, H), lambda i, j: (0, 0)),    # w1 resident
                pl.BlockSpec((1, H), lambda i, j: (0, 0)),    # b1 resident
                pl.BlockSpec((H, tn), lambda i, j: (0, j)),   # w2 N-tiled
                pl.BlockSpec((1, tn), lambda i, j: (0, j)),   # b2 N-tiled
            ],
            out_specs=pl.BlockSpec((tm, tn), lambda i, j: (i, j)),
        ),
        compiler_params=pltpu.CompilerParams(
            dimension_semantics=("parallel", "parallel"),
            vmem_limit_bytes=48 << 20,
        ),
    )(z, w1, b1, w2, b2)


class WrapperPallas:
    """JAX/Pallas port of Wrapper (latent='z', vanilla GAN branch)."""

    def __init__(self, z_dim=32, hidden=64, channels=4, spatial=16,
                 latent="z", is_style=False):
        assert latent == "z" and not is_style, \
            "only the latent=='z' / vanilla branch is implemented"
        self.latent = latent
        self.is_style = is_style
        self.z_dim = z_dim
        self.hidden = hidden
        self.channels = channels
        self.spatial = spatial
        out_dim = channels * spatial * spatial
        self.out_dim = out_dim

        # Deterministic synthetic generator weights; bf16 weights, f32 biases.
        k = jax.random.PRNGKey(42)
        k1, k2 = jax.random.split(k)
        self.w1 = (jax.random.normal(k1, (z_dim, hidden), jnp.float32)
                   / jnp.sqrt(z_dim)).astype(jnp.bfloat16)
        self.b1 = jnp.zeros((1, hidden), jnp.float32)
        self.w2 = (jax.random.normal(k2, (hidden, out_dim), jnp.float32)
                   / jnp.sqrt(hidden)).astype(jnp.bfloat16)
        self.b2 = jnp.zeros((1, out_dim), jnp.float32)

    def _pick_tiles(self, B, D):
        # Only grid when the batch/output are big enough to amortize grid steps.
        if B < 128 or B % 128 != 0 or D % 512 != 0:
            return None
        tm = 256 if B % 256 == 0 else 128
        for tn in (2048, 1024, 512):
            if D % tn == 0:
                return tm, tn
        return None

    def __call__(self, param):
        # Wrapper.forward, latent == 'z', not stylegan:  image = self.model(param)
        B = param.shape[0]
        z = param.astype(jnp.float32)
        tiles = self._pick_tiles(B, self.out_dim)
        if tiles is None:
            flat = _run_generator_small(z, self.w1, self.b1, self.w2, self.b2)
        else:
            tm, tn = tiles
            flat = _run_generator_tiled(z, self.w1, self.b1, self.w2, self.b2,
                                        tm, tn)
        # Contiguous row-major reshape to NCHW (free; kept outside the kernel
        # so the kernel output stays lane-dense).
        return flat.reshape(B, self.channels, self.spatial, self.spatial)


if __name__ == "__main__":
    B, Z = 2, 32
    wrapper = WrapperPallas(z_dim=Z, hidden=64, channels=4, spatial=16)

    key = jax.random.PRNGKey(0)
    z = jax.random.normal(key, (B, Z), jnp.float32)

    image = wrapper(z)
    image = jax.block_until_ready(image)

    assert image.shape == (B, 4, 16, 16)
    assert image.dtype == jnp.float32
    assert bool(jnp.all(jnp.isfinite(image)))
    print("KERNEL_OK")
</pallas_src>

<mosaic_0001>
module attributes {stable_mosaic.version = 11 : i64} {
  func.func @_generator_kernel(%arg0: memref<2x32xf32, #tpu.memory_space<vmem>>, %arg1: memref<32x64xbf16, #tpu.memory_space<vmem>>, %arg2: memref<1x64xf32, #tpu.memory_space<vmem>>, %arg3: memref<64x1024xbf16, #tpu.memory_space<vmem>>, %arg4: memref<1x1024xf32, #tpu.memory_space<vmem>>, %arg5: memref<2x1024xf32, #tpu.memory_space<vmem>>) attributes {dimension_semantics = [], scalar_prefetch = 0 : i64, scratch_operands = 0 : i64, tpu.core_type = #tpu.core_type<tc>} {
    %c0 = arith.constant 0 : index
    %c0_0 = arith.constant 0 : index
    %0 = vector.load %arg0[%c0, %c0_0] : memref<2x32xf32, #tpu.memory_space<vmem>>, vector<2x32xf32>
    %1 = arith.truncf %0 : vector<2x32xf32> to vector<2x32xbf16>
    %c0_1 = arith.constant 0 : index
    %c0_2 = arith.constant 0 : index
    %2 = vector.load %arg1[%c0_1, %c0_2] : memref<32x64xbf16, #tpu.memory_space<vmem>>, vector<32x64xbf16>
    %cst = arith.constant dense<0.000000e+00> : vector<2x64xf32>
    %3 = tpu.matmul %1, %2, %cst {dimension_numbers = #tpu.dot_dimension_numbers<[1], [0], [0], [1], [0, 0, 1, 1], [], []>} : vector<2x32xbf16>, vector<32x64xbf16>, vector<2x64xf32> -> vector<2x64xf32>
    %c0_3 = arith.constant 0 : index
    %c0_4 = arith.constant 0 : index
    %4 = vector.load %arg2[%c0_3, %c0_4] : memref<1x64xf32, #tpu.memory_space<vmem>>, vector<1x64xf32>
    %5 = vector.broadcast %4 : vector<1x64xf32> to vector<2x64xf32>
    %6 = arith.addf %3, %5 : vector<2x64xf32>
    %cst_5 = arith.constant 0.000000e+00 : f32
    %7 = vector.broadcast %cst_5 : f32 to vector<2x64xf32>
    %8 = arith.maximumf %6, %7 : vector<2x64xf32>
    %9 = arith.truncf %8 : vector<2x64xf32> to vector<2x64xbf16>
    %c0_6 = arith.constant 0 : index
    %c0_7 = arith.constant 0 : index
    %10 = vector.load %arg3[%c0_6, %c0_7] : memref<64x1024xbf16, #tpu.memory_space<vmem>>, vector<64x1024xbf16>
    %cst_8 = arith.constant dense<0.000000e+00> : vector<2x1024xf32>
    %11 = tpu.matmul %9, %10, %cst_8 {dimension_numbers = #tpu.dot_dimension_numbers<[1], [0], [0], [1], [0, 0, 1, 1], [], []>} : vector<2x64xbf16>, vector<64x1024xbf16>, vector<2x1024xf32> -> vector<2x1024xf32>
    %c0_9 = arith.constant 0 : index
    %c0_10 = arith.constant 0 : index
    %12 = vector.load %arg4[%c0_9, %c0_10] : memref<1x1024xf32, #tpu.memory_space<vmem>>, vector<1x1024xf32>
    %13 = vector.broadcast %12 : vector<1x1024xf32> to vector<2x1024xf32>
    %14 = arith.addf %11, %13 : vector<2x1024xf32>
    %15 = math.tanh %14 : vector<2x1024xf32>
    %c0_11 = arith.constant 0 : index
    %c0_12 = arith.constant 0 : index
    %16 = vector.load %arg5[%c0_11, %c0_12] : memref<2x1024xf32, #tpu.memory_space<vmem>>, vector<2x1024xf32>
    tpu.vector_store %arg5[%c0_11, %c0_12], %15 {strides = array<i32>} : memref<2x1024xf32, #tpu.memory_space<vmem>>, vector<2x1024xf32>,
    return
  }
}

</mosaic_0001>

<bundles_post_ra>
// kernel: tpu_custom_call.1
= control target key start
LH: loop header
LB: loop body
LE: loop exit
PB: predicated region body
PF: predicated region fallthrough
CT: control target
= control target key end

     0   :  { %10 = vsyncpa [#allocation3], 0  ;;  %s890_s0 = inlined_call_operand.hbm [shape: f32[2,32], index: 0, kind: input, shape index: {}]   ;;  %s891_s1 = inlined_call_operand.hbm [shape: bf16[32,64], index: 1, kind: input, shape index: {}]   ;;  %s892_s2 = inlined_call_operand.vmem [shape: f32[1,64], index: 2, kind: input, shape index: {}]   ;;  %s893_s3 = inlined_call_operand.hbm [shape: bf16[64,1024], index: 3, kind: input, shape index: {}]   ;;  %s894_s4 = inlined_call_operand.hbm [shape: f32[1,1024], index: 4, kind: input, shape index: {}]   ;;  %s895_s5 = inlined_call_operand.hbm [shape: f32[2,1024], index: 5, kind: output, shape index: {}]  }
   0x1   :  { %11 = vsyncpa [#allocation6], 0 }
   0x2   :  { %12 = vsyncpa [#allocation9], 0  ;;  %s29_s20 = sshll.u32 %s891_s1, 4  ;;  %s30_s20 = int_to_ptr.hbm [resolvable:$true] %s29_s20 }
   0x3   :  { %13 = vsyncpa [#allocation4], 0  ;;  %s827_s21 = smov [#allocation5]   ;;  %s19_s25 = sshll.u32 %s890_s0, 4  ;;  %s20_s25 = int_to_ptr.hbm [resolvable:$true] %s19_s25 }
   0x4   :  { %s31_s22 = sshll.u32 %s827_s21, 4  ;;  %s828_s26 = smov 64   ;;  %s32_s22 = int_to_ptr.vmem [resolvable:$true] %s31_s22 }
   0x5   :  { %s829_s27 = smov 4   ;;  %s830_s28 = smov [#allocation2]  }
   0x6   :  { %37 = dma.hbm_to_vmem [thread:$0]  %s30_s20, 256, %s32_s22, [#allocation6], %s828_s26, %s828_s26, %s829_s27  }
   0x7   :  { %s21_s29 = sshll.u32 %s830_s28, 4  ;;  %s44_s7 = sshll.u32 %s893_s3, 4  ;;  %s22_s29 = int_to_ptr.vmem [resolvable:$true] %s21_s29  ;;  %s45_s7 = int_to_ptr.hbm [resolvable:$true] %s44_s7 }
   0x8   :  { %24 = dma.hbm_to_vmem [thread:$0]  %s20_s25, 32, %s22_s29, [#allocation3]  }
   0x9   :  { %s831_s1 = smov [#allocation7]   ;;  %s58_s0 = sshll.u32 %s894_s4, 4  ;;  %s59_s0 = int_to_ptr.hbm [resolvable:$true] %s58_s0 }
   0xa   :  { %s46_s8 = sshll.u32 %s831_s1, 4  ;;  %s832_s11 = smov 512   ;;  %s47_s8 = int_to_ptr.vmem [resolvable:$true] %s46_s8 }
   0xb   :  { %s833_s12 = smov 32   ;;  %s834_s13 = smov [#allocation8]  }
   0xc   :  { %52 = dma.hbm_to_vmem [thread:$0]  %s45_s7, 4096, %s47_s8, [#allocation6], %s832_s11, %s832_s11, %s833_s12  }
   0xd   :  { %s60_s14 = sshll.u32 %s834_s13, 4  ;;  %s61_s14 = int_to_ptr.vmem [resolvable:$true] %s60_s14 }
   0xe   :  { %63 = dma.hbm_to_vmem [thread:$0]  %s59_s0, 128, %s61_s14, [#allocation9]  }
   0xf   :  { %819 = dma.done.wait [#allocation3], 32  }
  0x10   :  { %820 = vsyncadd [#allocation3], 4294967264 }
  0x11   :  { %821 = dma.done.wait [#allocation6], 4352  }
  0x12   :  { %822 = vsyncadd [#allocation6], 4294962944 }
  0x13   :  { %823 = dma.done.wait [#allocation9], 128  }
  0x14   :  { %824 = vsyncadd [#allocation9], 4294967168  ;;  %v640_v0 = vld [vmem:[#allocation5 + $0x8] sm:$0xff]  ;;  %v639_v1 = vld [vmem:[#allocation5] sm:$0xff]  ;;  %vm103_vm0 = vcmask 261120   ;;  %vm332_vm1 = vcmask 523264  }
  0x15   :  { %v81_v2 = vld [vmem:[#allocation2] sm:$0x3]  ;;  %v601_v3 = vld [vmem:[#allocation7 + $0xc0] sm:$0xf]  ;;  %v665_v5 = vld [vmem:[#allocation7 + $0xc4] sm:$0xf]  ;;  %113 = vmatpush.bf16.msra.mxu0 %v640_v0 }
  0x16   :  { %v669_v4 = vld [vmem:[#allocation7 + $0xdc] sm:$0xf0]  ;;  %v603_v7 = vld [vmem:[#allocation7 + $0xe0] sm:$0xf0]  ;;  %v609_v8 = vld [vmem:[#allocation7 + $0xc8] sm:$0xf]  ;;  %v82_v19 = vpack.c.bf16 %v81_v2, %v81_v2 }
  0x17   :  { %v602_v6 = vor.u32 %v669_v4, %v601_v3  ;;  %v670_v9 = vld [vmem:[#allocation7 + $0xe4] sm:$0xf0]  ;;  %v606_v10 = vor.u32 %v665_v5, %v603_v7  ;;  %v666_v12 = vld [vmem:[#allocation7 + $0xcc] sm:$0xf]  ;;  %v569_v14 = vld [vmem:[#allocation7 + $0x80] sm:$0xf] }
  0x18   :  { %v610_v11 = vor.u32 %v670_v9, %v609_v8  ;;  %v611_v13 = vld [vmem:[#allocation7 + $0xe8] sm:$0xf0]  ;;  %v661_v16 = vld [vmem:[#allocation7 + $0x9c] sm:$0xf0]  ;;  %v657_v17 = vld [vmem:[#allocation7 + $0x84] sm:$0xf] }
  0x19   :  { %340 = vmatpush.bf16.msra.mxu1 %v602_v6  ;;  %v614_v15 = vor.u32 %v666_v12, %v611_v13  ;;  %v571_v18 = vld [vmem:[#allocation7 + $0xa0] sm:$0xf0]  ;;  %353 = vmatpush.bf16.msra.mxu2 %v606_v10  ;;  %v570_v20 = vor.u32 %v661_v16, %v569_v14  ;;  %v577_v22 = vld [vmem:[#allocation7 + $0x88] sm:$0xf]  ;;  %v658_v24 = vld [vmem:[#allocation7 + $0x8c] sm:$0xf] }
  0x1a   :  { %366 = vmatpush.bf16.msra.mxu3 %v610_v11  ;;  %v574_v21 = vor.u32 %v657_v17, %v571_v18  ;;  %v662_v23 = vld [vmem:[#allocation7 + $0xa4] sm:$0xf0]  ;;  %114 = vmatpush.bf16.msra.mxu0 %v639_v1  ;;  %v579_v26 = vld [vmem:[#allocation7 + $0xa8] sm:$0xf0]  ;;  %v537_v28 = vld [vmem:[#allocation7 + $0x40] sm:$0xf] }
  0x1b   :  { %v578_v25 = vor.u32 %v662_v23, %v577_v22  ;;  %v582_v27 = vor.u32 %v658_v24, %v579_v26  ;;  %v653_v29 = vld [vmem:[#allocation7 + $0x5c] sm:$0xf0]  ;;  %v649_v30 = vld [vmem:[#allocation7 + $0x44] sm:$0xf]  ;;  %v545_v33 = vld [vmem:[#allocation7 + $0x48] sm:$0xf] }
  0x1c   :  { %v538_v31 = vor.u32 %v653_v29, %v537_v28  ;;  %v539_v32 = vld [vmem:[#allocation7 + $0x60] sm:$0xf0]  ;;  %v654_v34 = vld [vmem:[#allocation7 + $0x64] sm:$0xf0]  ;;  %v650_v37 = vld [vmem:[#allocation7 + $0x4c] sm:$0xf] }
  0x1d   :  { %341 = vmatpush.bf16.msra.mxu1 %v570_v20  ;;  %502 = vmatmul.msk.bf16.vlgmr.msra.gmra.mxu0 %vm103_vm0, %v82_v19  ;;  %v542_v35 = vor.u32 %v649_v30, %v539_v32  ;;  %v546_v36 = vor.u32 %v654_v34, %v545_v33  ;;  %v547_v38 = vld [vmem:[#allocation7 + $0x68] sm:$0xf0]  ;;  %v505_v40 = vld [vmem:[#allocation7] sm:$0xf]  ;;  %v641_v42 = vld [vmem:[#allocation7 + $0x4] sm:$0xf] }
  0x1e   :  { %379 = vmatpush.bf16.msrb.mxu0 %v614_v15  ;;  %354 = vmatpush.bf16.msra.mxu2 %v574_v21  ;;  %v550_v39 = vor.u32 %v650_v37, %v547_v38  ;;  %v645_v41 = vld [vmem:[#allocation7 + $0x1c] sm:$0xf0]  ;;  %v507_v44 = vld [vmem:[#allocation7 + $0x20] sm:$0xf0]  ;;  %v513_v45 = vld [vmem:[#allocation7 + $0x8] sm:$0xf] }
  0x1f   :  { %367 = vmatpush.bf16.msra.mxu3 %v578_v25  ;;  %v506_v43 = vor.u32 %v645_v41, %v505_v40  ;;  %v646_v46 = vld [vmem:[#allocation7 + $0x24] sm:$0xf0]  ;;  %v510_v47 = vor.u32 %v641_v42, %v507_v44  ;;  %v642_v49 = vld [vmem:[#allocation7 + $0xc] sm:$0xf]  ;;  %v667_v52 = vld [vmem:[#allocation7 + $0xd4] sm:$0xf] }
  0x20   :  { %v514_v48 = vor.u32 %v646_v46, %v513_v45  ;;  %v515_v50 = vld [vmem:[#allocation7 + $0x28] sm:$0xf0]  ;;  %v619_v53 = vld [vmem:[#allocation7 + $0xf0] sm:$0xf0]  ;;  %v625_v54 = vld [vmem:[#allocation7 + $0xd8] sm:$0xf] }
  0x21   :  { %342 = vmatpush.bf16.msra.mxu1 %v538_v31  ;;  %v518_v51 = vor.u32 %v642_v49, %v515_v50  ;;  %v622_v55 = vor.u32 %v667_v52, %v619_v53  ;;  %v672_v56 = vld [vmem:[#allocation7 + $0xf4] sm:$0xf0]  ;;  %v617_v57 = vld [vmem:[#allocation7 + $0xd0] sm:$0xf]  ;;  %v668_v61 = vld [vmem:[#allocation7 + $0xdc] sm:$0xf] }
  0x22   :  { %380 = vmatpush.bf16.msrb.mxu0 %v582_v27  ;;  %355 = vmatpush.bf16.msra.mxu2 %v542_v35  ;;  %v671_v58 = vld [vmem:[#allocation7 + $0xec] sm:$0xf0]  ;;  %v626_v59 = vor.u32 %v672_v56, %v625_v54  ;;  %v627_v62 = vld [vmem:[#allocation7 + $0xf8] sm:$0xf0]  ;;  %v659_v63 = vld [vmem:[#allocation7 + $0x94] sm:$0xf] }
  0x23   :  { %368 = vmatpush.bf16.msra.mxu3 %v546_v36  ;;  %v618_v60 = vor.u32 %v671_v58, %v617_v57  ;;  %v630_v0 = vor.u32 %v668_v61, %v627_v62  ;;  %v587_v1 = vld [vmem:[#allocation7 + $0xb0] sm:$0xf0]  ;;  %v593_v2 = vld [vmem:[#allocation7 + $0x98] sm:$0xf]  ;;  %v585_v6 = vld [vmem:[#allocation7 + $0x90] sm:$0xf] }
  0x24   :  { %v664_v3 = vld [vmem:[#allocation7 + $0xb4] sm:$0xf0]  ;;  %v590_v4 = vor.u32 %v659_v63, %v587_v1  ;;  %v663_v7 = vld [vmem:[#allocation7 + $0xac] sm:$0xf0]  ;;  %v660_v8 = vld [vmem:[#allocation7 + $0x9c] sm:$0xf] }
  0x25   :  { %343 = vmatpush.bf16.msra.mxu1 %v506_v43  ;;  %v594_v5 = vor.u32 %v664_v3, %v593_v2  ;;  %v586_v9 = vor.u32 %v663_v7, %v585_v6  ;;  %v595_v10 = vld [vmem:[#allocation7 + $0xb8] sm:$0xf0]  ;;  %v651_v11 = vld [vmem:[#allocation7 + $0x54] sm:$0xf]  ;;  %v561_v14 = vld [vmem:[#allocation7 + $0x58] sm:$0xf] }
  0x26   :  { %381 = vmatpush.bf16.msrb.mxu0 %v550_v39  ;;  %356 = vmatpush.bf16.msra.mxu2 %v510_v47  ;;  %v555_v12 = vld [vmem:[#allocation7 + $0x70] sm:$0xf0]  ;;  %v598_v13 = vor.u32 %v660_v8, %v595_v10  ;;  %v656_v15 = vld [vmem:[#allocation7 + $0x74] sm:$0xf0]  ;;  %v553_v16 = vld [vmem:[#allocation7 + $0x50] sm:$0xf] }
  0x27   :  { %369 = vmatpush.bf16.msra.mxu3 %v514_v48  ;;  %v558_v17 = vor.u32 %v651_v11, %v555_v12  ;;  %v655_v18 = vld [vmem:[#allocation7 + $0x6c] sm:$0xf0]  ;;  %v652_v19 = vld [vmem:[#allocation7 + $0x5c] sm:$0xf]  ;;  %v562_v21 = vor.u32 %v656_v15, %v561_v14  ;;  %v643_v23 = vld [vmem:[#allocation7 + $0x14] sm:$0xf] }
  0x28   :  { %v563_v20 = vld [vmem:[#allocation7 + $0x78] sm:$0xf0]  ;;  %v554_v22 = vor.u32 %v655_v18, %v553_v16  ;;  %v523_v24 = vld [vmem:[#allocation7 + $0x30] sm:$0xf0]  ;;  %v529_v25 = vld [vmem:[#allocation7 + $0x18] sm:$0xf] }
  0x29   :  { %392 = vmatpush.bf16.msrb.mxu1 %v618_v60  ;;  %v566_v26 = vor.u32 %v652_v19, %v563_v20  ;;  %v648_v27 = vld [vmem:[#allocation7 + $0x34] sm:$0xf0]  ;;  %v521_v28 = vld [vmem:[#allocation7 + $0x10] sm:$0xf]  ;;  %v644_v30 = vld [vmem:[#allocation7 + $0x1c] sm:$0xf]  ;;  %v526_v32 = vor.u32 %v643_v23, %v523_v24 }
  0x2a   :  { %382 = vmatpush.bf16.msrb.mxu0 %v518_v51  ;;  %405 = vmatpush.bf16.msrb.mxu2 %v622_v55  ;;  %v647_v29 = vld [vmem:[#allocation7 + $0x2c] sm:$0xf0]  ;;  %v531_v31 = vld [vmem:[#allocation7 + $0x38] sm:$0xf0]  ;;  %v530_v33 = vor.u32 %v648_v27, %v529_v25  ;;  %v682_v36 = vld [vmem:[%s892_s2] ss:$0 sm:$0xff] }
  0x2b   :  { %418 = vmatpush.bf16.msrb.mxu3 %v626_v59  ;;  %v522_v34 = vor.u32 %v647_v29, %v521_v28  ;;  %v534_v35 = vor.u32 %v644_v30, %v531_v31  ;;  %v154_v42 = vld [vmem:[#allocation8] sm:$0xff]  ;;  %vm462_vm2 = vcmask 1041408   ;;  %vm464_vm3 = vcmask 1045508   ;;  %s835_s2 = smov [#allocation10]   ;;  %s482_s18 = sshll.u32 %s895_s5, 4  ;;  %s483_s18 = int_to_ptr.hbm [resolvable:$true] %s482_s18 }
  0x2c   :  { %v159_v44 = vperm.slane %v154_v42, 3  ;;  %v156_v46 = vperm.slane %v154_v42, 0  ;;  %v157_v47 = vperm.slane %v154_v42, 1  ;;  %v158_v49 = vperm.slane %v154_v42, 2  ;;  %s480_s15 = sshll.u32 %s835_s2, 4  ;;  %s481_s15 = int_to_ptr.vmem [resolvable:$true] %s480_s15 }
  0x2d   :  { %393 = vmatpush.bf16.msrb.mxu1 %v586_v9  ;;  %vm466_vm4 = vcmask 1043456   ;;  %v160_v7 = vperm.slane %v154_v42, 4  ;;  %v161_v8 = vperm.slane %v154_v42, 5  ;;  %v162_v10 = vperm.slane %v154_v42, 6 }
  0x2e   :  { %431 = vmatpush.bf16.msra.mxu0 %v630_v0  ;;  %406 = vmatpush.bf16.msrb.mxu2 %v590_v4  ;;  %v163_v0 = vperm.slane %v154_v42, 7 }
  0x2f   :  { %419 = vmatpush.bf16.msrb.mxu3 %v594_v5 }
  0x31   :  { %394 = vmatpush.bf16.msrb.mxu1 %v554_v22 }
  0x32   :  { %432 = vmatpush.bf16.msra.mxu0 %v598_v13  ;;  %407 = vmatpush.bf16.msrb.mxu2 %v558_v17 }
  0x33   :  { %420 = vmatpush.bf16.msrb.mxu3 %v562_v21 }
  0x35   :  { %395 = vmatpush.bf16.msrb.mxu1 %v522_v34 }
  0x36   :  { %433 = vmatpush.bf16.msra.mxu0 %v566_v26  ;;  %408 = vmatpush.bf16.msrb.mxu2 %v526_v32 }
  0x37   :  { %421 = vmatpush.bf16.msrb.mxu3 %v530_v33 }
  0x3a   :  { %434 = vmatpush.bf16.msra.mxu0 %v534_v35 }
  0x9a   :  { %v116_v37 = vpop.f32.mrf.mxu0 }
  0x9b   :  { %v117_v38 = vadd.f32 %v682_v36, %v116_v37 }
  0x9d   :  { %v120_v39 = vmax.f32 %v117_v38, 0.0 }
  0x9f   :  { %v121_v40 = vpack.c.bf16 %v120_v39, %v120_v39 }
  0xa1   :  { %631 = vmatmul.msk.bf16.vlgmr.msra.gmra.mxu1 %vm332_vm1, %v121_v40  ;;  %632 = vmatmul.msk.bf16.vlgmr.msra.gmra.mxu2 %vm332_vm1, %v121_v40 }
  0xa2   :  { %633 = vmatmul.msk.bf16.vlgmr.msra.gmra.mxu3 %vm332_vm1, %v121_v40  ;;  %634 = vmatmul.msk.bf16.vlgmr.msrb.gmra.mxu0 %vm332_vm1, %v121_v40  ;;  %v118_v41 = vpop.f32.mrf.mxu0 }
  0xb1   :  { %635 = vmatmul.msk.bf16.vlgmr.msrb.gmra.mxu1 %vm332_vm1, %v121_v40  ;;  %636 = vmatmul.msk.bf16.vlgmr.msrb.gmra.mxu2 %vm332_vm1, %v121_v40 }
  0xb2   :  { %637 = vmatmul.msk.bf16.vlgmr.msrb.gmra.mxu3 %vm332_vm1, %v121_v40  ;;  %638 = vmatmul.msk.bf16.vlgmr.msra.gmra.mxu0 %vm332_vm1, %v121_v40 }
 0x11e   :  { %v345_v43 = vpop.f32.mrf.mxu1 }
 0x11f   :  { %v384_v45 = vpop.f32.mrf.mxu0  ;;  %v346_v51 = vadd.f32 %v345_v43, %v156_v46 }
 0x120   :  { %v385_v48 = vadd.f32 %v384_v45, %v159_v44 }
 0x122   :  { %683 = vtanh.f32 %v385_v48 }
 0x124   :  { %v358_v50 = vpop.f32.mrf.mxu2 }
 0x125   :  { %v359_v52 = vadd.f32 %v358_v50, %v157_v47  ;;  %v371_v53 = vpop.f32.mrf.mxu3 }
 0x126   :  { %v372_v54 = vadd.f32 %v371_v53, %v158_v49  ;;  %v347_v55 = vpop.f32.mrf.mxu1 }
 0x127   :  { %685 = vtanh.f32 %v359_v52  ;;  %v386_v56 = vpop.f32.mrf.mxu0 }
 0x128   :  { %687 = vtanh.f32 %v372_v54  ;;  %v684_v57 = vpop.eup %683 }
 0x129   :  { %689 = vtanh.f32 %v346_v51  ;;  %v458_v2 = vrot.slane %v684_v57, 2 }
 0x12c   :  { %v360_v58 = vpop.f32.mrf.mxu2 }
 0x12d   :  { %v686_v59 = vpop.eup %685  ;;  %v373_v60 = vpop.f32.mrf.mxu3 }
 0x12e   :  { %v688_v61 = vpop.eup %687  ;;  %v456_v62 = vrot.slane %v686_v59, 6  ;;  %v397_v63 = vpop.f32.mrf.mxu1 }
 0x12f   :  { %v690_v1 = vpop.eup %689  ;;  %v457_v3 = vrot.slane %v688_v61, 4  ;;  %v436_v4 = vpop.f32.mrf.mxu0  ;;  %v398_v13 = vadd.f32 %v397_v63, %v160_v7 }
 0x130   :  { %v463_v5 = vsel %vm462_vm2, %v690_v1, %v456_v62  ;;  %v437_v9 = vadd.f32 %v436_v4, %v163_v0 }
 0x131   :  { %v465_v6 = vsel %vm464_vm3, %v457_v3, %v458_v2 }
 0x132   :  { %v467_v11 = vsel %vm466_vm4, %v463_v5, %v465_v6  ;;  %691 = vtanh.f32 %v437_v9 }
 0x133   :  { %473 = vst [vmem:[#allocation10] sm:$0xff] %v467_v11 }
 0x134   :  { %v410_v12 = vpop.f32.mrf.mxu2 }
 0x135   :  { %v411_v14 = vadd.f32 %v410_v12, %v161_v8  ;;  %v423_v15 = vpop.f32.mrf.mxu3 }
 0x136   :  { %v424_v16 = vadd.f32 %v423_v15, %v162_v10  ;;  %v399_v17 = vpop.f32.mrf.mxu1 }
 0x137   :  { %693 = vtanh.f32 %v411_v14  ;;  %v438_v18 = vpop.f32.mrf.mxu0 }
 0x138   :  { %695 = vtanh.f32 %v424_v16  ;;  %v692_v19 = vpop.eup %691 }
 0x139   :  { %697 = vtanh.f32 %v398_v13  ;;  %v461_v26 = vrot.slane %v692_v19, 2 }
 0x13c   :  { %v412_v20 = vpop.f32.mrf.mxu2 }
 0x13d   :  { %v694_v21 = vpop.eup %693  ;;  %v425_v22 = vpop.f32.mrf.mxu3 }
 0x13e   :  { %v696_v23 = vpop.eup %695  ;;  %v459_v24 = vrot.slane %v694_v21, 6 }
 0x13f   :  { %v698_v25 = vpop.eup %697  ;;  %v460_v27 = vrot.slane %v696_v23, 4 }
 0x140   :  { %v468_v28 = vsel %vm462_vm2, %v698_v25, %v459_v24 }
 0x141   :  { %v469_v29 = vsel %vm464_vm3, %v460_v27, %v461_v26 }
 0x142   :  { %v470_v30 = vsel %vm466_vm4, %v468_v28, %v469_v29 }
 0x143   :  { %474 = vst [vmem:[#allocation10 + $0x8] sm:$0xff] %v470_v30 }
 0x144   :  { %485 = dma.vmem_to_hbm [thread:$0]  %s481_s15, 256, %s483_s18, [#allocation4]  }
 0x145   :  { %825 = dma.done.wait [#allocation4], 256  }
 0x146   :  { %826 = vsyncadd [#allocation4], 4294967040 }
 0x147   :  { %490 = vsyncpa [#allocation3], 1 }
 0x148   :  { %491 = vsyncpa [#allocation6], 1 }
 0x149   :  { %492 = vsyncpa [#allocation9], 1 }
 0x14a   :  { %493 = vsyncpa [#allocation4], 1 }

</bundles_post_ra>
